<compile_context>
chip_gen: v7x
topology: tpu7x:2x2x1
jax: 0.10.0
libtpu: 0.0.40
codegen_flags: <defaults>
</compile_context>

<pallas_src>
import jax
import jax.numpy as jnp
from jax import lax
from jax.experimental import pallas as pl
from jax.experimental.pallas import tpu as pltpu

IN_FEATURES = 256
OUT_FEATURES = 256


def linear_kernel(x_ref, w_ref, o_ref):
    # w_ref holds W in torch layout (out_features, in_features); contract the
    # in_features axis of both operands directly on the MXU (no wrapper-side
    # weight.T), accumulate in f32.
    o_ref[...] = lax.dot_general(
        x_ref[...],
        w_ref[...],
        dimension_numbers=(((1,), (1,)), ((), ())),
        preferred_element_type=jnp.float32,
    ).astype(o_ref.dtype)


def linear_no_bias(x, weight, *, block_m=512):
    """y = x @ W.T  (forward of torch.nn.Linear(256, 256, bias=False)).

    x:      (N, in_features)            float32
    weight: (out_features, in_features) float32  (torch layout, NOT transposed)
    """
    n, in_f = x.shape
    out_f, in_f_w = weight.shape
    assert in_f == in_f_w

    # Pad the row count up to a multiple of 8 sublanes so output stores are
    # full-sublane (avoids masked vst.msk partial stores for tiny batches like
    # N=1), and tile M so the 256 KiB weight stays VMEM-resident across all
    # row tiles (bounded VMEM even for arbitrarily large N).
    tm = min(block_m, max(8, 8 * pl.cdiv(n, 8)))
    n_pad = tm * pl.cdiv(n, tm)
    if n_pad != n:
        x = jnp.pad(x, ((0, n_pad - n), (0, 0)))

    grid = (n_pad // tm,)

    out = pl.pallas_call(
        linear_kernel,
        out_shape=jax.ShapeDtypeStruct((n_pad, out_f), jnp.float32),
        grid_spec=pl.GridSpec(
            grid=grid,
            in_specs=[
                # x row tile: marches over M with the grid.
                pl.BlockSpec((tm, in_f), lambda i: (i, 0)),
                # full weight, same block every step -> stays VMEM-resident
                # (fetched from HBM once, not re-DMAed per row tile).
                pl.BlockSpec((out_f, in_f), lambda i: (0, 0)),
            ],
            out_specs=pl.BlockSpec((tm, out_f), lambda i: (i, 0)),
        ),
        compiler_params=pltpu.CompilerParams(
            # Row tiles are independent: shard across both TensorCores on v7x.
            dimension_semantics=("parallel",),
        ),
        cost_estimate=pl.CostEstimate(
            flops=2 * n_pad * in_f * out_f,
            transcendentals=0,
            bytes_accessed=4 * (n_pad * in_f + out_f * in_f + n_pad * out_f),
        ),
    )(x, weight)

    # TODO(synk): if accuracy budget allows, cast the resident weight to bf16
    # to halve the dominant HBM transfer on v6e/v7x (kept f32 here to match
    # the torch float32 module exactly).
    return out[:n] if n_pad != n else out


if __name__ == "__main__":
    key = jax.random.PRNGKey(0)
    kx, kw = jax.random.split(key)

    # Matches Sub.example_inputs(): (1, 256) float32.
    x = jax.random.normal(kx, (1, IN_FEATURES), dtype=jnp.float32)
    # Deterministic init mimicking torch.nn.Linear default (uniform +-1/sqrt(fan_in)).
    bound = 1.0 / (IN_FEATURES ** 0.5)
    weight = jax.random.uniform(
        kw, (OUT_FEATURES, IN_FEATURES), dtype=jnp.float32,
        minval=-bound, maxval=bound,
    )

    y = linear_no_bias(x, weight)
    y = jax.block_until_ready(y)

    # Sanity check against plain-JAX reference.
    y_ref = x @ weight.T
    assert y.shape == (1, OUT_FEATURES)
    assert jnp.allclose(y, y_ref, atol=1e-5, rtol=1e-5)

    print("KERNEL_OK")
</pallas_src>

<mosaic_0001>
module attributes {stable_mosaic.version = 11 : i64} {
  func.func @linear_kernel(%arg0: i32, %arg1: memref<8x256xf32, #tpu.memory_space<vmem>>, %arg2: memref<256x256xf32, #tpu.memory_space<vmem>>, %arg3: memref<8x256xf32, #tpu.memory_space<vmem>>) attributes {dimension_semantics = [#tpu.dimension_semantics<parallel>], iteration_bounds = array<i64: 1>, scalar_prefetch = 0 : i64, scratch_operands = 0 : i64, tpu.core_type = #tpu.core_type<tc>, window_params = [{transform_indices = @transform_0, window_bounds = array<i64: 8, 256>}, {pipeline_mode = #tpu.pipeline_mode<synchronous>, transform_indices = @transform_1, window_bounds = array<i64: 256, 256>}, {transform_indices = @transform_2, window_bounds = array<i64: 8, 256>}]} {
    %c0 = arith.constant 0 : index
    %c0_0 = arith.constant 0 : index
    %0 = vector.load %arg1[%c0, %c0_0] : memref<8x256xf32, #tpu.memory_space<vmem>>, vector<8x256xf32>
    %c0_1 = arith.constant 0 : index
    %c0_2 = arith.constant 0 : index
    %1 = vector.load %arg2[%c0_1, %c0_2] : memref<256x256xf32, #tpu.memory_space<vmem>>, vector<256x256xf32>
    %cst = arith.constant dense<0.000000e+00> : vector<8x256xf32>
    %2 = tpu.matmul %0, %1, %cst {dimension_numbers = #tpu.dot_dimension_numbers<[1], [1], [0], [0], [0, 0, 1, 0], [], []>} : vector<8x256xf32>, vector<256x256xf32>, vector<8x256xf32> -> vector<8x256xf32>
    %c0_3 = arith.constant 0 : index
    %c0_4 = arith.constant 0 : index
    %3 = vector.load %arg3[%c0_3, %c0_4] : memref<8x256xf32, #tpu.memory_space<vmem>>, vector<8x256xf32>
    tpu.vector_store %arg3[%c0_3, %c0_4], %2 {strides = array<i32>} : memref<8x256xf32, #tpu.memory_space<vmem>>, vector<8x256xf32>,
    return
  }
  func.func @transform_0(%arg0: i32) -> (i32, i32) {
    %c0_i32 = arith.constant 0 : i32
    %c0_i32_0 = arith.constant 0 : i32
    return %arg0, %c0_i32 : i32, i32
  }
  func.func @transform_1(%arg0: i32) -> (i32, i32) {
    %c0_i32 = arith.constant 0 : i32
    %c0_i32_0 = arith.constant 0 : i32
    %c0_i32_1 = arith.constant 0 : i32
    return %c0_i32, %c0_i32_0 : i32, i32
  }
  func.func @transform_2(%arg0: i32) -> (i32, i32) {
    %c0_i32 = arith.constant 0 : i32
    %c0_i32_0 = arith.constant 0 : i32
    return %arg0, %c0_i32 : i32, i32
  }
}

</mosaic_0001>

<bundles_post_ra>
// kernel: tpu_custom_call.1
= control target key start
LH: loop header
LB: loop body
LE: loop exit
PB: predicated region body
PF: predicated region fallthrough
CT: control target
= control target key end

     0   :  { %7 = vsyncpa [#allocation3], 0  ;;  %s397_s0 = inlined_call_operand.hbm [shape: f32[8,256], index: 0, kind: input, shape index: {}]   ;;  %s398_s1 = inlined_call_operand.hbm [shape: f32[256,256], index: 1, kind: input, shape index: {}]   ;;  %s399_s2 = inlined_call_operand.hbm [shape: f32[8,256], index: 2, kind: output, shape index: {}]  }
   0x1   :  { %8 = vsyncpa [#allocation6], 0 }
   0x2   :  { %9 = vsyncpa [#allocation4], 0  ;;  %s334_s9 = smov [#allocation2]   ;;  %s335_s11 = smov [#allocation5]  }
   0x3   :  { %s16_s10 = sshll.u32 %s334_s9, 4  ;;  %s25_s12 = sshll.u32 %s335_s11, 4  ;;  %s17_s10 = int_to_ptr.vmem [resolvable:$true] %s16_s10  ;;  %s354_s12 = int_to_ptr.vmem [resolvable:$true] %s25_s12 }
   0x4   :  { %s262_s15 = scalar_lea.hbm %s397_s0, 256 }
   0x5   :  { %p263_p0 = scmp.ne.s32.totalorder %s397_s0, %s262_s15  ;;  %p266_p1 = scmp.lt.u32.totalorder %s262_s15, %s397_s0 }
   0x7   :  { %p268_p2 = pnand %p266_p1, %p263_p0 }
   0x9   :  { %271 = shalt.err (!%p268_p2)
}
   0xa   :  { %s272_s20 = scalar_lea.vmem %s17_s10, 256  ;;  %p277_p4 = scmp.lt.s32.totalorder %s17_s10, %s17_s10 }
   0xb   :  { %p273_p3 = scmp.ne.s32.totalorder %s17_s10, %s272_s20  ;;  %p278_p5 = scmp.lt.s32.totalorder %s272_s20, %s272_s20 }
   0xd   :  { %p279_p6 = por %p278_p5, %p277_p4 }
   0xf   :  { %p280_p7 = pnand %p279_p6, %p273_p3 }
  0x11   :  { %283 = shalt.err (!%p280_p7)
}
  0x12   :  { %19 = dma.hbm_to_vmem [thread:$0]  %s397_s0, 256, %s17_s10, [#allocation3]  }
  0x13   :  { %s284_s25 = scalar_lea.hbm %s398_s1, 8192 }
  0x14   :  { %p285_p8 = scmp.ne.s32.totalorder %s398_s1, %s284_s25  ;;  %p288_p9 = scmp.lt.u32.totalorder %s284_s25, %s398_s1 }
  0x16   :  { %p290_p10 = pnand %p288_p9, %p285_p8 }
  0x18   :  { %293 = shalt.err (!%p290_p10)
}
  0x19   :  { %s294_s30 = scalar_lea.vmem %s354_s12, 8192  ;;  %p299_p12 = scmp.lt.s32.totalorder %s354_s12, %s354_s12 }
  0x1a   :  { %p295_p11 = scmp.ne.s32.totalorder %s354_s12, %s294_s30  ;;  %p300_p13 = scmp.lt.s32.totalorder %s294_s30, %s294_s30 }
  0x1c   :  { %p301_p0 = por %p300_p13, %p299_p12 }
  0x1e   :  { %p302_p1 = pnand %p301_p0, %p295_p11 }
  0x20   :  { %305 = shalt.err (!%p302_p1)
}
  0x21   :  { %s336_s0 = smov 256   ;;  %s337_s3 = smov 16  }
  0x22   :  { %31 = dma.hbm_to_vmem [thread:$0]  %s398_s1, 8192, %s354_s12, [#allocation6], %s336_s0, %s336_s0, %s337_s3  }
  0x23   :  { %328 = dma.done.wait [#allocation3], 256  }
  0x24   :  { %329 = vsyncadd [#allocation3], 4294967040 }
  0x25   :  { %330 = dma.done.wait [#allocation6], 8192  }
  0x26   :  { %331 = vsyncadd [#allocation6], 4294959104  ;;  %v41_v0 = vld [vmem:[#allocation5 + $0x8] sm:$0xff]  ;;  %v43_v1 = vld [vmem:[#allocation5 + $0x18] sm:$0xff]  ;;  %s338_s1 = smov [#allocation7]  }
  0x27   :  { %v40_v2 = vld [vmem:[#allocation5] sm:$0xff]  ;;  %v193_v3 = vpack.c.bf16 %v43_v1, %v41_v0  ;;  %v42_v4 = vld [vmem:[#allocation5 + $0x10] sm:$0xff]  ;;  %v45_v5 = vld [vmem:[#allocation5 + $0x28] sm:$0xff]  ;;  %s183_s6 = sshll.u32 %s338_s1, 4  ;;  %s184_s6 = int_to_ptr.vmem [resolvable:$true] %s183_s6 }
  0x28   :  { %v47_v6 = vld [vmem:[#allocation5 + $0x38] sm:$0xff]  ;;  %v195_v7 = vpack.c.bf16 %v42_v4, %v40_v2  ;;  %v44_v9 = vld [vmem:[#allocation5 + $0x20] sm:$0xff]  ;;  %v46_v10 = vld [vmem:[#allocation5 + $0x30] sm:$0xff]  ;;  %s306_s7 = scalar_lea.vmem %s184_s6, 256  ;;  %p311_p3 = scmp.lt.s32.totalorder %s184_s6, %s184_s6 }
  0x29   :  { %v197_v8 = vpack.c.bf16 %v47_v6, %v45_v5  ;;  %194 = vmatprep.subr.bf16.mxu0 %v193_v3  ;;  %v49_v11 = vld [vmem:[#allocation5 + $0x48] sm:$0xff]  ;;  %v51_v12 = vld [vmem:[#allocation5 + $0x58] sm:$0xff]  ;;  %v199_v13 = vpack.c.bf16 %v46_v10, %v44_v9  ;;  %v48_v15 = vld [vmem:[#allocation5 + $0x40] sm:$0xff]  ;;  %p307_p2 = scmp.ne.s32.totalorder %s184_s6, %s306_s7  ;;  %p312_p4 = scmp.lt.s32.totalorder %s306_s7, %s306_s7 }
  0x2a   :  { %196 = vmatpush1.bf16.xpose.msra.mxu0 %v195_v7  ;;  %v201_v14 = vpack.c.bf16 %v51_v12, %v49_v11  ;;  %v50_v16 = vld [vmem:[#allocation5 + $0x50] sm:$0xff]  ;;  %v53_v17 = vld [vmem:[#allocation5 + $0x68] sm:$0xff]  ;;  %v55_v18 = vld [vmem:[#allocation5 + $0x78] sm:$0xff] }
  0x2b   :  { %198 = vmatprep.subr.bf16.mxu0 %v197_v8  ;;  %v203_v19 = vpack.c.bf16 %v50_v16, %v48_v15  ;;  %v205_v20 = vpack.c.bf16 %v55_v18, %v53_v17  ;;  %v52_v21 = vld [vmem:[#allocation5 + $0x60] sm:$0xff]  ;;  %v54_v22 = vld [vmem:[#allocation5 + $0x70] sm:$0xff]  ;;  %v39_v23 = vld [vmem:[#allocation2 + $0x8] sm:$0xff]  ;;  %p313_p5 = por %p312_p4, %p311_p3 }
  0x2c   :  { %v57_v24 = vld [vmem:[#allocation5 + $0x88] sm:$0xff]  ;;  %v59_v25 = vld [vmem:[#allocation5 + $0x98] sm:$0xff]  ;;  %168 = vmatprep.mubr.f32.mxu0 %v39_v23  ;;  %v207_v26 = vpack.c.bf16 %v54_v22, %v52_v21  ;;  %v56_v28 = vld [vmem:[#allocation5 + $0x80] sm:$0xff] }
  0x2d   :  { %v209_v27 = vpack.c.bf16 %v59_v25, %v57_v24  ;;  %v58_v29 = vld [vmem:[#allocation5 + $0x90] sm:$0xff]  ;;  %v61_v30 = vld [vmem:[#allocation5 + $0xa8] sm:$0xff]  ;;  %v63_v31 = vld [vmem:[#allocation5 + $0xb8] sm:$0xff]  ;;  %p314_p6 = pnand %p313_p5, %p307_p2 }
  0x2e   :  { %v211_v32 = vpack.c.bf16 %v58_v29, %v56_v28  ;;  %v213_v33 = vpack.c.bf16 %v63_v31, %v61_v30  ;;  %v60_v34 = vld [vmem:[#allocation5 + $0xa0] sm:$0xff]  ;;  %v62_v35 = vld [vmem:[#allocation5 + $0xb0] sm:$0xff]  ;;  %v65_v36 = vld [vmem:[#allocation5 + $0xc8] sm:$0xff] }
  0x2f   :  { %v67_v37 = vld [vmem:[#allocation5 + $0xd8] sm:$0xff]  ;;  %v215_v38 = vpack.c.bf16 %v62_v35, %v60_v34  ;;  %v64_v40 = vld [vmem:[#allocation5 + $0xc0] sm:$0xff]  ;;  %v66_v41 = vld [vmem:[#allocation5 + $0xd0] sm:$0xff] }
  0x30   :  { %v217_v39 = vpack.c.bf16 %v67_v37, %v65_v36  ;;  %v69_v42 = vld [vmem:[#allocation5 + $0xe8] sm:$0xff]  ;;  %v71_v43 = vld [vmem:[#allocation5 + $0xf8] sm:$0xff]  ;;  %v219_v44 = vpack.c.bf16 %v66_v41, %v64_v40  ;;  %v68_v46 = vld [vmem:[#allocation5 + $0xe0] sm:$0xff] }
  0x31   :  { %v221_v45 = vpack.c.bf16 %v71_v43, %v69_v42  ;;  %v70_v47 = vld [vmem:[#allocation5 + $0xf0] sm:$0xff]  ;;  %v73_v48 = vld [vmem:[#allocation5 + $0x108] sm:$0xff]  ;;  %v75_v49 = vld [vmem:[#allocation5 + $0x118] sm:$0xff] }
  0x32   :  { %200 = vmatpush1.bf16.xpose.msra.mxu0 %v199_v13  ;;  %v223_v50 = vpack.c.bf16 %v70_v47, %v68_v46  ;;  %v225_v51 = vpack.c.bf16 %v75_v49, %v73_v48  ;;  %v72_v52 = vld [vmem:[#allocation5 + $0x100] sm:$0xff]  ;;  %v74_v53 = vld [vmem:[#allocation5 + $0x110] sm:$0xff]  ;;  %v77_v54 = vld [vmem:[#allocation5 + $0x128] sm:$0xff] }
  0x33   :  { %202 = vmatprep.subr.bf16.mxu0 %v201_v14  ;;  %v79_v55 = vld [vmem:[#allocation5 + $0x138] sm:$0xff]  ;;  %v227_v56 = vpack.c.bf16 %v74_v53, %v72_v52  ;;  %v76_v58 = vld [vmem:[#allocation5 + $0x120] sm:$0xff]  ;;  %v78_v59 = vld [vmem:[#allocation5 + $0x130] sm:$0xff] }
  0x34   :  { %v229_v57 = vpack.c.bf16 %v79_v55, %v77_v54  ;;  %v81_v60 = vld [vmem:[#allocation5 + $0x148] sm:$0xff]  ;;  %v83_v61 = vld [vmem:[#allocation5 + $0x158] sm:$0xff]  ;;  %v231_v62 = vpack.c.bf16 %v78_v59, %v76_v58  ;;  %v80_v0 = vld [vmem:[#allocation5 + $0x140] sm:$0xff] }
  0x35   :  { %v233_v63 = vpack.c.bf16 %v83_v61, %v81_v60  ;;  %v82_v1 = vld [vmem:[#allocation5 + $0x150] sm:$0xff]  ;;  %v85_v2 = vld [vmem:[#allocation5 + $0x168] sm:$0xff]  ;;  %v87_v3 = vld [vmem:[#allocation5 + $0x178] sm:$0xff] }
  0x36   :  { %v235_v4 = vpack.c.bf16 %v82_v1, %v80_v0  ;;  %v237_v5 = vpack.c.bf16 %v87_v3, %v85_v2  ;;  %v84_v6 = vld [vmem:[#allocation5 + $0x160] sm:$0xff]  ;;  %v86_v7 = vld [vmem:[#allocation5 + $0x170] sm:$0xff]  ;;  %v89_v8 = vld [vmem:[#allocation5 + $0x188] sm:$0xff] }
  0x37   :  { %v91_v9 = vld [vmem:[#allocation5 + $0x198] sm:$0xff]  ;;  %v239_v10 = vpack.c.bf16 %v86_v7, %v84_v6  ;;  %v88_v12 = vld [vmem:[#allocation5 + $0x180] sm:$0xff]  ;;  %v90_v13 = vld [vmem:[#allocation5 + $0x190] sm:$0xff] }
  0x38   :  { %v241_v11 = vpack.c.bf16 %v91_v9, %v89_v8  ;;  %v93_v14 = vld [vmem:[#allocation5 + $0x1a8] sm:$0xff]  ;;  %v95_v15 = vld [vmem:[#allocation5 + $0x1b8] sm:$0xff]  ;;  %v243_v16 = vpack.c.bf16 %v90_v13, %v88_v12  ;;  %v92_v18 = vld [vmem:[#allocation5 + $0x1a0] sm:$0xff] }
  0x39   :  { %v245_v17 = vpack.c.bf16 %v95_v15, %v93_v14  ;;  %v99_v21 = vld [vmem:[#allocation5 + $0x1d8] sm:$0xff]  ;;  %v96_v24 = vld [vmem:[#allocation5 + $0x1c0] sm:$0xff]  ;;  %v98_v25 = vld [vmem:[#allocation5 + $0x1d0] sm:$0xff] }
  0x3a   :  { %204 = vmatpush1.bf16.xpose.msra.mxu0 %v203_v19  ;;  %v94_v19 = vld [vmem:[#allocation5 + $0x1b0] sm:$0xff]  ;;  %v251_v28 = vpack.c.bf16 %v98_v25, %v96_v24  ;;  %v100_v30 = vld [vmem:[#allocation5 + $0x1e0] sm:$0xff] }
  0x3b   :  { %206 = vmatprep.subr.bf16.mxu0 %v205_v20  ;;  %v97_v20 = vld [vmem:[#allocation5 + $0x1c8] sm:$0xff]  ;;  %v247_v22 = vpack.c.bf16 %v94_v19, %v92_v18  ;;  %v102_v31 = vld [vmem:[#allocation5 + $0x1f0] sm:$0xff] }
  0x3c   :  { %v249_v23 = vpack.c.bf16 %v99_v21, %v97_v20 }
  0x42   :  { %208 = vmatpush1.bf16.xpose.msra.mxu0 %v207_v26  ;;  %v101_v26 = vld [vmem:[#allocation5 + $0x1e8] sm:$0xff] }
  0x43   :  { %210 = vmatprep.subr.bf16.mxu0 %v209_v27  ;;  %v103_v27 = vld [vmem:[#allocation5 + $0x1f8] sm:$0xff] }
  0x44   :  { %v253_v29 = vpack.c.bf16 %v103_v27, %v101_v26 }
  0x4a   :  { %212 = vmatpush1.bf16.xpose.msra.mxu0 %v211_v32  ;;  %v255_v32 = vpack.c.bf16 %v102_v31, %v100_v30 }
  0x4b   :  { %214 = vmatprep.subr.bf16.mxu0 %v213_v33  ;;  %v38_v33 = vld [vmem:[#allocation2] sm:$0xff] }
  0x52   :  { %216 = vmatpush1.bf16.xpose.msra.mxu0 %v215_v38 }
  0x53   :  { %218 = vmatprep.subr.bf16.mxu0 %v217_v39 }
  0x5a   :  { %220 = vmatpush1.bf16.xpose.msra.mxu0 %v219_v44 }
  0x5b   :  { %222 = vmatprep.subr.bf16.mxu0 %v221_v45 }
  0x62   :  { %224 = vmatpush1.bf16.xpose.msra.mxu0 %v223_v50 }
  0x63   :  { %226 = vmatprep.subr.bf16.mxu0 %v225_v51 }
  0x6a   :  { %228 = vmatpush1.bf16.xpose.msra.mxu0 %v227_v56 }
  0x6b   :  { %230 = vmatprep.subr.bf16.mxu0 %v229_v57 }
  0x72   :  { %232 = vmatpush1.bf16.xpose.msra.mxu0 %v231_v62 }
  0x73   :  { %234 = vmatprep.subr.bf16.mxu0 %v233_v63 }
  0x7a   :  { %236 = vmatpush1.bf16.xpose.msra.mxu0 %v235_v4 }
  0x7b   :  { %238 = vmatprep.subr.bf16.mxu0 %v237_v5 }
  0x82   :  { %240 = vmatpush1.bf16.xpose.msra.mxu0 %v239_v10 }
  0x83   :  { %242 = vmatprep.subr.bf16.mxu0 %v241_v11 }
  0x8a   :  { %244 = vmatpush1.bf16.xpose.msra.mxu0 %v243_v16 }
  0x8b   :  { %246 = vmatprep.subr.bf16.mxu0 %v245_v17 }
  0x92   :  { %248 = vmatpush1.bf16.xpose.msra.mxu0 %v247_v22 }
  0x93   :  { %250 = vmatprep.subr.bf16.mxu0 %v249_v23 }
  0x9a   :  { %252 = vmatpush1.bf16.xpose.msra.mxu0 %v251_v28 }
  0x9b   :  { %254 = vmatprep.subr.bf16.mxu0 %v253_v29 }
  0xa2   :  { %256 = vmatpush1.bf16.xpose.msra.mxu0 %v255_v32 }
  0xa9   :  { %169 = vmatmul.mubr.f32.vlgmr.msra.gmra.mrb[0].mxu0 %v38_v33 }
 0x17c   :  { %v170_v34 = vpop.f32.mrb[0].mxu0 }
 0x17d   :  { %175 = vst [vmem:[#allocation7] sm:$0xff] %v170_v34  ;;  %v172_v35 = vpop.f32.mrb[1].mxu0 }
 0x17e   :  { %176 = vst [vmem:[#allocation7 + $0x8] sm:$0xff] %v172_v35 }
 0x17f   :  { %317 = shalt.err (!%p314_p6)
}
 0x180   :  { %s318_s10 = scalar_lea.hbm %s399_s2, 256 }
 0x181   :  { %p319_p7 = scmp.ne.s32.totalorder %s399_s2, %s318_s10  ;;  %p322_p8 = scmp.lt.u32.totalorder %s318_s10, %s399_s2 }
 0x183   :  { %p324_p9 = pnand %p322_p8, %p319_p7 }
 0x185   :  { %327 = shalt.err (!%p324_p9)
}
 0x186   :  { %186 = dma.vmem_to_hbm [thread:$0]  %s184_s6, 256, %s399_s2, [#allocation4]  }
 0x187   :  { %332 = dma.done.wait [#allocation4], 256  }
 0x188   :  { %333 = vsyncadd [#allocation4], 4294967040 }
 0x189   :  { %190 = vsyncpa [#allocation3], 1 }
 0x18a   :  { %191 = vsyncpa [#allocation6], 1 }
 0x18b   :  { %192 = vsyncpa [#allocation4], 1 }

</bundles_post_ra>
